<compile_context>
chip_gen: v5e
topology: v5e:2x2
jax: 0.10.0
libtpu: 0.0.40
codegen_flags: <defaults>
</compile_context>

<pallas_src>
import functools
from typing import NamedTuple

import jax
import jax.numpy as jnp
from jax.experimental import pallas as pl
from jax.experimental.pallas import tpu as pltpu


def _round_up(v, m):
    return ((v + m - 1) // m) * m


def _sublane_multiple(dtype):
    """Native sublane tiling multiple for a dtype (second-to-last dim)."""
    return max(8, 32 // jnp.dtype(dtype).itemsize)


class SpikingLayerParams(NamedTuple):
    w: jax.Array          # (Hp, Hp) prepared fc1 weight (transposed / packed)
    b: jax.Array          # (1, Hp) prepared fc1 bias
    hidden: int           # original hidden size H
    pack: int             # P logical rows folded per 128-lane vector row
    leak: float           # leak_factor (baked as compile-time constant)
    post_scale: float     # multiplier for relu(fc1) in-kernel
                          # (1.0 when (1 - leak) was folded into w/b at prep)


def _spiking_layer_kernel(x_ref, w_ref, b_ref, o_ref, *,
                          leak, post_scale, threshold):
    """Fused fc1 + ReLU + leaky residual mix + spike threshold on a row tile.

    x_ref : VMEM (TM, Hp)  f32|bf16   -- lane-packed input rows (residual)
    w_ref : VMEM (Hp, Hp)  f32|bf16   -- block-diagonal packed fc1 weight
    b_ref : VMEM (1,  Hp)  f32        -- lane-packed fc1 bias
    o_ref : VMEM (TM, Hp)  out_dtype  -- binary spikes (0 / 1)
    """
    x = x_ref[...]
    x32 = x.astype(jnp.float32)                           # residual (f32 epilogue)
    # fc1 on the MXU (operands in w_ref's dtype, accumulation in f32).
    h = jnp.dot(x.astype(w_ref.dtype), w_ref[...],
                preferred_element_type=jnp.float32)
    h = jnp.maximum(h + b_ref[...], 0.0)                  # bias + ReLU (f32 VPU)
    if post_scale != 1.0:                                 # only if fold was skipped
        h = post_scale * h
    mixed = leak * x32 + h                                # leaky residual mix (f32)
    o_ref[...] = (mixed > threshold).astype(o_ref.dtype)  # spike fn


def prepare_spiking_layer_params(fc1_w, fc1_b, leak_factor, *,
                                 use_bf16_matmul=False,
                                 auto_bf16_weight_bytes=8 << 20):
    """One-time parameter prep (hoisted out of the per-call path)."""
    H = int(fc1_w.shape[0])
    leak = float(leak_factor)

    # Lane packing factor: fold P = 128 // H logical rows into one vector row
    # when H divides 128, so every load/store/VPU op is lane-dense.
    P = 128 // H if (H < 128 and 128 % H == 0) else 1
    Hp = H * P
    # TODO(synk): when H is neither a multiple of 128 nor a divisor of 128 the
    # last dim stays at H (full-extent block, masked stores); a lane-padded
    # variant would require an extra HBM pass over x, so it is not done here.

    wt = jnp.asarray(fc1_w, jnp.float32).T          # (in, out): one-time transpose
    b = jnp.asarray(fc1_b, jnp.float32)

    # Fold (1 - leak) into weight/bias: relu((1-l) z) == (1-l) relu(z) for
    # leak <= 1, removing one VPU multiply per element from the epilogue.
    post = 1.0 - leak
    if post >= 0.0:
        wt = wt * post
        b = b * post
        post_scale = 1.0
    else:
        post_scale = post

    if P > 1:
        eye = jnp.eye(P, dtype=jnp.float32)
        w_prep = jnp.einsum("pq,io->piqo", eye, wt).reshape(Hp, Hp)
        b_prep = jnp.tile(b, P).reshape(1, Hp)
    else:
        w_prep = wt
        b_prep = b.reshape(1, Hp)

    # bf16 weights: opt-in, or automatic only when the resident f32 weight
    # would be too large for VMEM (a v7x 64 MiB concern at big H).  The MXU
    # accumulation stays f32 in-kernel either way.
    if use_bf16_matmul or (Hp * Hp * 4 > auto_bf16_weight_bytes):
        w_prep = w_prep.astype(jnp.bfloat16)

    return SpikingLayerParams(w=w_prep, b=b_prep, hidden=H, pack=P,
                              leak=leak, post_scale=post_scale)


def spiking_transformer_layer(x, params, spike_threshold=0.5,
                              out_dtype=jnp.float32):
    """x: (B, S, H) f32/bf16; params from prepare_spiking_layer_params.

    out_dtype=jnp.int8 is the perf-recommended setting (binary spikes, 4x less
    write traffic); jnp.float32 default matches the PyTorch module exactly.
    """
    B, S, H = x.shape
    assert H == params.hidden, "params were prepared for a different hidden size"
    P = params.pack
    Hp = H * P
    M = B * S

    # Lane-dense presentation: pure row-major reshape (bitcast, no HBM pass)
    # unless M is not a multiple of P (rare), in which case pad a few rows.
    xf = x.reshape(M, H)
    M_rows = _round_up(M, P)
    pad_rows = M_rows - M
    if pad_rows:
        xf = jnp.pad(xf, ((0, pad_rows), (0, 0)))   # rare fallback; one extra pass
    Mp = M_rows // P
    xp = xf.reshape(Mp, Hp)

    x_itemsize = jnp.dtype(xp.dtype).itemsize
    out_itemsize = jnp.dtype(out_dtype).itemsize
    w_itemsize = jnp.dtype(params.w.dtype).itemsize

    # ---- Row-tile choice ----------------------------------------------------
    # Big tiles (HBM-bound kernel), sublane multiples for both in/out dtypes,
    # >= 2 grid steps when there is enough work (v7x megacore), and no host
    # padding: a non-divisible trailing tile is masked by Pallas.
    sub_mult = max(_sublane_multiple(xp.dtype), _sublane_multiple(out_dtype))
    target = 4096                               # packed rows (~2 MiB f32 x tile)
    TMp = min(target, _round_up(Mp, sub_mult))
    if TMp >= Mp:
        if Mp >= 4 * sub_mult:                  # enough work: split for 2 TCs
            TMp = min(TMp, _round_up(-(-Mp // 2), sub_mult))
        if TMp >= Mp:
            TMp = Mp                            # single full-extent tile

    # ---- Generation-aware VMEM budget (v7x: 64 MiB vs 128 MiB v5e/v6e) ------
    try:
        vmem_cap = int(pltpu.get_tpu_info().vmem_capacity_bytes)
    except Exception:
        vmem_cap = 64 << 20                     # conservative: v7x per-TC
    budget = (vmem_cap * 3) // 4

    def vmem_need(tm):
        return (2 * tm * Hp * x_itemsize        # double-buffered x tiles
                + 2 * tm * Hp * out_itemsize    # double-buffered out tiles
                + 2 * Hp * Hp * w_itemsize      # resident weight (2 bufs, worst case)
                + 2 * Hp * 4                    # bias
                + (1 << 20))                    # headroom

    while TMp > sub_mult and vmem_need(TMp) > budget:
        TMp = max(sub_mult, _round_up(TMp // 2, sub_mult))
    TMp = min(TMp, Mp)
    # TODO(synk): for very large H (P=1) where even the bf16 resident weight
    # exceeds the budget, an output-column grid axis with (Hp, TN) weight
    # tiles would be needed; not required for the packed small-H path.

    grid_m = -(-Mp // TMp)
    vmem_limit = int(min(budget + (4 << 20), max(4 << 20, 2 * vmem_need(TMp))))

    cost = pl.CostEstimate(
        flops=2 * M * H * H,                    # logical flops (P-fold zeros excluded)
        transcendentals=0,
        bytes_accessed=(Mp * Hp * x_itemsize + Hp * Hp * w_itemsize + Hp * 4
                        + Mp * Hp * out_itemsize),
    )

    out = pl.pallas_call(
        functools.partial(_spiking_layer_kernel,
                          leak=params.leak,
                          post_scale=params.post_scale,
                          threshold=float(spike_threshold)),
        out_shape=jax.ShapeDtypeStruct((Mp, Hp), out_dtype),
        grid_spec=pltpu.PrefetchScalarGridSpec(
            num_scalar_prefetch=0,
            grid=(grid_m,),
            in_specs=[
                # x row tile (the only streamed operand).  Default double
                # buffering; bump to pl.Buffered(3) only if a trace shows
                # exposed input DMA.
                pl.BlockSpec((TMp, Hp), lambda i: (i, 0)),
                pl.BlockSpec((Hp, Hp), lambda i: (0, 0)),   # weight (resident)
                pl.BlockSpec((1, Hp), lambda i: (0, 0)),    # bias   (resident)
            ],
            out_specs=pl.BlockSpec((TMp, Hp), lambda i: (i, 0)),
        ),
        compiler_params=pltpu.CompilerParams(
            dimension_semantics=("parallel",),  # shard row tiles across TCs (v7x)
            vmem_limit_bytes=vmem_limit,
        ),
        cost_estimate=cost,
    )(xp, params.w, params.b)

    if pad_rows:
        return out.reshape(M_rows, H)[:M].reshape(B, S, H)
    return out.reshape(B, S, H)


if __name__ == "__main__":
    # Small shapes consistent with the module: (batch=2, seq=8, hidden=32).
    B, S, H = 2, 8, 32
    key = jax.random.PRNGKey(0)
    kx, kw1, kb1, kw2, kb2 = jax.random.split(key, 5)

    # Deterministic parameter init (PyTorch-Linear-like uniform bounds).
    bound = 1.0 / float(H) ** 0.5
    fc1_w = jax.random.uniform(kw1, (H, H), jnp.float32, -bound, bound)
    fc1_b = jax.random.uniform(kb1, (H,), jnp.float32, -bound, bound)
    # fc2 exists in __init__ but is unused in forward; init for completeness.
    fc2_w = jax.random.uniform(kw2, (H, H), jnp.float32, -bound, bound)
    fc2_b = jax.random.uniform(kb2, (H,), jnp.float32, -bound, bound)
    leak_factor = 0.9
    spike_threshold = 0.5

    x = jax.random.normal(kx, (B, S, H), jnp.float32)

    # One-time weight prep (outside the per-call path), then the fused kernel.
    params = prepare_spiking_layer_params(fc1_w, fc1_b, leak_factor)

    out_f32 = spiking_transformer_layer(x, params, spike_threshold)  # PyTorch parity
    out_i8 = spiking_transformer_layer(x, params, spike_threshold,
                                       out_dtype=jnp.int8)           # perf setting
    jax.block_until_ready((out_f32, out_i8))

    # Pure-JAX reference (f32, original unfolded parameters).
    h_ref = jnp.maximum(x @ fc1_w.T + fc1_b, 0.0)
    mixed_ref = leak_factor * x + (1.0 - leak_factor) * h_ref
    ref = mixed_ref > spike_threshold
    # Allow disagreement only where `mixed` sits within f32 noise of the
    # threshold (the (1-leak) fold changes f32 rounding slightly).
    near_thr = jnp.abs(mixed_ref - spike_threshold) < 1e-5

    assert out_f32.shape == (B, S, H) and out_f32.dtype == jnp.float32
    assert out_i8.shape == (B, S, H) and out_i8.dtype == jnp.int8
    ok_f32 = (out_f32.astype(bool) == ref) | near_thr
    ok_i8 = ((out_i8 != 0) == ref) | near_thr
    assert bool(jnp.all(ok_f32)), "Pallas f32 output mismatch vs reference"
    assert bool(jnp.all(ok_i8)), "Pallas int8 output mismatch vs reference"

    print("KERNEL_OK")
</pallas_src>

<mosaic_0001>
module attributes {stable_mosaic.version = 11 : i64} {
  func.func @_spiking_layer_kernel(%arg0: i32, %arg1: memref<4x128xf32, #tpu.memory_space<vmem>>, %arg2: memref<128x128xf32, #tpu.memory_space<vmem>>, %arg3: memref<1x128xf32, #tpu.memory_space<vmem>>, %arg4: memref<4x128xf32, #tpu.memory_space<vmem>>) attributes {dimension_semantics = [#tpu.dimension_semantics<parallel>], iteration_bounds = array<i64: 1>, scalar_prefetch = 0 : i64, scratch_operands = 0 : i64, tpu.core_type = #tpu.core_type<tc>, window_params = [{transform_indices = @transform_0, window_bounds = array<i64: 4, 128>}, {pipeline_mode = #tpu.pipeline_mode<synchronous>, transform_indices = @transform_1, window_bounds = array<i64: 128, 128>}, {pipeline_mode = #tpu.pipeline_mode<synchronous>, transform_indices = @transform_2, window_bounds = array<i64: 1, 128>}, {transform_indices = @transform_3, window_bounds = array<i64: 4, 128>}]} {
    %c0 = arith.constant 0 : index
    %c0_0 = arith.constant 0 : index
    %0 = vector.load %arg1[%c0, %c0_0] : memref<4x128xf32, #tpu.memory_space<vmem>>, vector<4x128xf32>
    %c0_1 = arith.constant 0 : index
    %c0_2 = arith.constant 0 : index
    %1 = vector.load %arg2[%c0_1, %c0_2] : memref<128x128xf32, #tpu.memory_space<vmem>>, vector<128x128xf32>
    %cst = arith.constant dense<0.000000e+00> : vector<4x128xf32>
    %2 = tpu.matmul %0, %1, %cst {dimension_numbers = #tpu.dot_dimension_numbers<[1], [0], [0], [1], [0, 0, 1, 1], [], []>} : vector<4x128xf32>, vector<128x128xf32>, vector<4x128xf32> -> vector<4x128xf32>
    %c0_3 = arith.constant 0 : index
    %c0_4 = arith.constant 0 : index
    %3 = vector.load %arg3[%c0_3, %c0_4] : memref<1x128xf32, #tpu.memory_space<vmem>>, vector<1x128xf32>
    %4 = vector.broadcast %3 : vector<1x128xf32> to vector<4x128xf32>
    %5 = arith.addf %2, %4 : vector<4x128xf32>
    %cst_5 = arith.constant 0.000000e+00 : f32
    %6 = vector.broadcast %cst_5 : f32 to vector<4x128xf32>
    %7 = arith.maximumf %5, %6 : vector<4x128xf32>
    %cst_6 = arith.constant 0.899999976 : f32
    %8 = vector.broadcast %cst_6 : f32 to vector<4x128xf32>
    %9 = arith.mulf %8, %0 : vector<4x128xf32>
    %10 = arith.addf %9, %7 : vector<4x128xf32>
    %cst_7 = arith.constant 5.000000e-01 : f32
    %11 = vector.broadcast %cst_7 : f32 to vector<4x128xf32>
    %12 = arith.cmpf ogt, %10, %11 : vector<4x128xf32>
    %13 = arith.extui %12 : vector<4x128xi1> to vector<4x128xi32>
    %14 = arith.sitofp %13 : vector<4x128xi32> to vector<4x128xf32>
    %c0_8 = arith.constant 0 : index
    %c0_9 = arith.constant 0 : index
    %15 = vector.load %arg4[%c0_8, %c0_9] : memref<4x128xf32, #tpu.memory_space<vmem>>, vector<4x128xf32>
    tpu.vector_store %arg4[%c0_8, %c0_9], %14 {strides = array<i32>} : memref<4x128xf32, #tpu.memory_space<vmem>>, vector<4x128xf32>,
    return
  }
  func.func @transform_0(%arg0: i32) -> (i32, i32) {
    %c0_i32 = arith.constant 0 : i32
    %c0_i32_0 = arith.constant 0 : i32
    return %arg0, %c0_i32 : i32, i32
  }
  func.func @transform_1(%arg0: i32) -> (i32, i32) {
    %c0_i32 = arith.constant 0 : i32
    %c0_i32_0 = arith.constant 0 : i32
    %c0_i32_1 = arith.constant 0 : i32
    return %c0_i32, %c0_i32_0 : i32, i32
  }
  func.func @transform_2(%arg0: i32) -> (i32, i32) {
    %c0_i32 = arith.constant 0 : i32
    %c0_i32_0 = arith.constant 0 : i32
    %c0_i32_1 = arith.constant 0 : i32
    return %c0_i32, %c0_i32_0 : i32, i32
  }
  func.func @transform_3(%arg0: i32) -> (i32, i32) {
    %c0_i32 = arith.constant 0 : i32
    %c0_i32_0 = arith.constant 0 : i32
    return %arg0, %c0_i32 : i32, i32
  }
}

</mosaic_0001>

<bundles_post_ra>
// kernel: tpu_custom_call.1
= control target key start
LH: loop header
LB: loop body
LE: loop exit
PB: predicated region body
PF: predicated region fallthrough
CT: control target
= control target key end

     0   :  { %8 = vsyncpa [#allocation3], 0  ;;  %s235_s0 = inlined_call_operand.hbm [shape: f32[4,128], index: 0, kind: input, shape index: {}]   ;;  %s236_s1 = inlined_call_operand.hbm [shape: f32[128,128], index: 1, kind: input, shape index: {}]   ;;  %s237_s2 = inlined_call_operand.vmem [shape: f32[1,128], index: 2, kind: input, shape index: {}]   ;;  %s238_s3 = inlined_call_operand.hbm [shape: f32[4,128], index: 3, kind: output, shape index: {}]  }
   0x1   :  { %9 = vsyncpa [#allocation6], 0 }
   0x2   :  { %10 = vsyncpa [#allocation4], 0  ;;  %s16_s14 = sshll.u32 %s235_s0, 4  ;;  %s197_s15 = smov [#allocation2]   ;;  %s17_s14 = int_to_ptr.hbm [resolvable:$true] %s16_s14 }
   0x3   :  { %s18_s16 = sshll.u32 %s197_s15, 4  ;;  %s26_s19 = sshll.u32 %s236_s1, 4  ;;  %s19_s16 = int_to_ptr.vmem [resolvable:$true] %s18_s16  ;;  %s27_s19 = int_to_ptr.hbm [resolvable:$true] %s26_s19 }
   0x4   :  { %21 = dma.hbm_to_vmem [thread:$0]  %s17_s14, 64, %s19_s16, [#allocation3]  }
   0x5   :  { %s198_s20 = smov [#allocation5]   ;;  %s199_s22 = smov 128  }
   0x6   :  { %s28_s21 = sshll.u32 %s198_s20, 4  ;;  %s200_s23 = smov 8   ;;  %s29_s21 = int_to_ptr.vmem [resolvable:$true] %s28_s21 }
   0x7   :  { %34 = dma.hbm_to_vmem [thread:$0]  %s27_s19, 2048, %s29_s21, [#allocation6], %s199_s22, %s199_s22, %s200_s23  }
   0x8   :  { %191 = dma.done.wait [#allocation3], 64  }
   0x9   :  { %192 = vsyncadd [#allocation3], 4294967232 }
   0xa   :  { %193 = dma.done.wait [#allocation6], 2048  }
   0xb   :  { %194 = vsyncadd [#allocation6], 4294965248  ;;  %v61_v0 = vld [vmem:[#allocation5 + $0x78] sm:$0xff]  ;;  %v60_v1 = vld [vmem:[#allocation5 + $0x70] sm:$0xff]  ;;  %s201_s24 = smov [#allocation7]   ;;  %s100_s28 = sshll.u32 %s238_s3, 4  ;;  %s101_s28 = int_to_ptr.hbm [resolvable:$true] %s100_s28 }
   0xc   :  { %66 = vmatpush.msra.mxu0 %v61_v0  ;;  %v59_v2 = vld [vmem:[#allocation5 + $0x68] sm:$0xff]  ;;  %v58_v3 = vld [vmem:[#allocation5 + $0x60] sm:$0xff]  ;;  %v57_v4 = vld [vmem:[#allocation5 + $0x58] sm:$0xff]  ;;  %s98_s25 = sshll.u32 %s201_s24, 4  ;;  %v202_v23 = vmov 0.0   ;;  %s99_s25 = int_to_ptr.vmem [resolvable:$true] %s98_s25 }
   0xd   :  { %v56_v5 = vld [vmem:[#allocation5 + $0x50] sm:$0xff]  ;;  %v55_v6 = vld [vmem:[#allocation5 + $0x48] sm:$0xff]  ;;  %v54_v7 = vld [vmem:[#allocation5 + $0x40] sm:$0xff] }
   0xe   :  { %67 = vmatpush.msra.mxu0 %v60_v1  ;;  %v53_v8 = vld [vmem:[#allocation5 + $0x38] sm:$0xff]  ;;  %v52_v9 = vld [vmem:[#allocation5 + $0x30] sm:$0xff]  ;;  %v51_v10 = vld [vmem:[#allocation5 + $0x28] sm:$0xff] }
   0xf   :  { %v50_v11 = vld [vmem:[#allocation5 + $0x20] sm:$0xff]  ;;  %v49_v12 = vld [vmem:[#allocation5 + $0x18] sm:$0xff]  ;;  %v48_v13 = vld [vmem:[#allocation5 + $0x10] sm:$0xff] }
  0x10   :  { %68 = vmatpush.msra.mxu0 %v59_v2  ;;  %v47_v14 = vld [vmem:[#allocation5 + $0x8] sm:$0xff]  ;;  %v46_v15 = vld [vmem:[#allocation5] sm:$0xff]  ;;  %v45_v16 = vld [vmem:[#allocation2] sm:$0xf] }
  0x11   :  { %v118_v17 = vld [vmem:[%s237_s2] ss:$0 sm:$0xff]  ;;  %v87_v19 = vmul.f32 0.9, %v45_v16 }
  0x12   :  { %69 = vmatpush.msra.mxu0 %v58_v3 }
  0x14   :  { %70 = vmatpush.msra.mxu0 %v57_v4 }
  0x16   :  { %71 = vmatpush.msra.mxu0 %v56_v5 }
  0x18   :  { %72 = vmatpush.msra.mxu0 %v55_v6 }
  0x1a   :  { %73 = vmatpush.msra.mxu0 %v54_v7 }
  0x1c   :  { %74 = vmatpush.msra.mxu0 %v53_v8 }
  0x1e   :  { %75 = vmatpush.msra.mxu0 %v52_v9 }
  0x20   :  { %76 = vmatpush.msra.mxu0 %v51_v10 }
  0x22   :  { %77 = vmatpush.msra.mxu0 %v50_v11 }
  0x24   :  { %78 = vmatpush.msra.mxu0 %v49_v12 }
  0x26   :  { %79 = vmatpush.msra.mxu0 %v48_v13 }
  0x28   :  { %80 = vmatpush.msra.mxu0 %v47_v14 }
  0x2a   :  { %81 = vmatpush.msra.mxu0 %v46_v15 }
  0x2b   :  { %82 = vmatmul.f32.vlgmr.msra.gmra.mxu0 %v45_v16 }
  0xa8   :  { %v83_v18 = vpop.f32.mrf.mxu0 }
  0xa9   :  { %v84_v20 = vadd.f32 %v118_v17, %v83_v18 }
  0xab   :  { %v86_v21 = vmax.f32 %v84_v20, 0.0 }
  0xad   :  { %v88_v22 = vadd.f32 %v87_v19, %v86_v21 }
  0xaf   :  { %vm89_vm0 = vcmp.gt.f32.partialorder %v88_v22, 0.5 }
  0xb0   :  { %v111_v24 = vsel %vm89_vm0, 1.0, %v202_v23 }
  0xb1   :  { %92 = vst [vmem:[#allocation7] sm:$0xf] %v111_v24 }
  0xb2   :  { %103 = dma.vmem_to_hbm [thread:$0]  %s99_s25, 64, %s101_s28, [#allocation4]  }
  0xb3   :  { %195 = dma.done.wait [#allocation4], 64  }
  0xb4   :  { %196 = vsyncadd [#allocation4], 4294967232 }
  0xb5   :  { %108 = vsyncpa [#allocation3], 1 }
  0xb6   :  { %109 = vsyncpa [#allocation6], 1 }
  0xb7   :  { %110 = vsyncpa [#allocation4], 1 }

</bundles_post_ra>
